<compile_context>
chip_gen: v5e
topology: v5e:2x2
jax: 0.10.0
libtpu: 0.0.40
codegen_flags: <defaults>
</compile_context>

<pallas_src>
import math
import functools

import jax
import jax.numpy as jnp
from jax.experimental import pallas as pl
from jax.experimental.pallas import tpu as pltpu


def _mha_kernel(x_ref, wqkv_ref, wproj_ref, bproj_ref, perm_ref, o_ref,
                q_scr, k_scr, v_scr, *, n_head: int, head_dim: int, block_b: int):
    T = x_ref.shape[1]
    C = n_head * head_dim
    rows = block_b * T

    # ---- fused QKV projection (scale pre-folded into q columns of W_qkv on host).
    # Cast to bf16 immediately so the f32 (rows, 3C) tensor is not kept live.
    x2 = x_ref[...].reshape(rows, C)                          # bf16 input
    qkv = jnp.dot(x2, wqkv_ref[...],
                  preferred_element_type=jnp.float32).astype(jnp.bfloat16)

    # ---- one-time head-major relayout into VMEM scratch: (n_head, rows, head_dim).
    # TODO(synk): for head_dim < 128 these lane slices still cross vreg lane tiles;
    # a layout-aware bulk relayout (pltpu.einshape) could replace them.
    for h in range(n_head):
        q_scr[h] = qkv[:, h * head_dim:(h + 1) * head_dim]
        k_scr[h] = qkv[:, C + h * head_dim:C + (h + 1) * head_dim]
        v_scr[h] = qkv[:, 2 * C + h * head_dim:2 * C + (h + 1) * head_dim]

    # ---- permuted-causal mask rebuilt in-kernel from the length-T permutation.
    row = jax.lax.broadcasted_iota(jnp.int32, (T, T), 0)
    allowed = (perm_ref[...] <= row)[None]                    # (1, T, T)
    neg_inf = jnp.float32(-jnp.inf)

    wproj = wproj_ref[...]                                    # (C, C) bf16, hoisted
    bias = jnp.broadcast_to(bproj_ref[...], (T, C))           # hoisted broadcast, f32

    def attend(b, carry):
        r0 = pl.multiple_of(b * T, T)
        qb = q_scr[:, pl.ds(r0, T), :]                        # (H, T, hd) bf16
        kb = k_scr[:, pl.ds(r0, T), :]
        vb = v_scr[:, pl.ds(r0, T), :]

        # Head-batched score matmul on the MXU; softmax stats in f32.
        s = jnp.einsum('hqd,hkd->hqk', qb, kb,
                       preferred_element_type=jnp.float32)    # (H, T, T)
        s = jnp.where(allowed, s, neg_inf)
        m = jnp.max(s, axis=-1, keepdims=True)
        p = jnp.exp(s - m)                                    # un-normalized, in [0, 1]
        denom = jnp.sum(p, axis=-1, keepdims=True)            # (H, T, 1) f32

        y = jnp.einsum('hqk,hkd->hqd', p.astype(jnp.bfloat16), vb,
                       preferred_element_type=jnp.float32)    # (H, T, hd) f32
        # Deferred softmax normalization: H*T*hd multiplies instead of H*T*T.
        y = y * pl.reciprocal(denom, approx=True)

        # Concat heads along lanes, then ONE full-depth (K = C) output projection.
        ycat = jnp.concatenate([y[h] for h in range(n_head)],
                               axis=-1).astype(jnp.bfloat16)  # (T, C)
        out = jnp.dot(ycat, wproj, preferred_element_type=jnp.float32) + bias
        o_ref[b] = out.astype(o_ref.dtype)
        return carry

    jax.lax.fori_loop(0, block_b, attend, 0, unroll=block_b <= 4)


def _vmem_limit_bytes():
    """Per-chip VMEM budget: ~48 MiB on v7x (64 MiB parts), ~96 MiB on v5e/v6e."""
    cap = None
    try:
        info = pltpu.get_tpu_info()
        cap = getattr(info, "vmem_capacity_bytes", None)
    except Exception:
        cap = None
    if not cap:
        cap = 64 * 1024 * 1024          # conservative fallback (v7x per-TC size)
    return int(min(cap * 3 // 4, 112 * 1024 * 1024))


def _choose_block_b(B, T, C, n_head, head_dim, vmem_limit):
    """Largest batch block whose per-grid-step footprint fits the VMEM budget,
    keeping >= 2 grid steps (v7x has two TensorCores sharing the parallel axis)."""
    lane = 128
    hd_pad = max(head_dim, lane)
    c_pad = -(-C // lane) * lane
    t_pad = -(-T // lane) * lane
    weights = 2 * (C * 3 * c_pad + C * c_pad) + 4 * c_pad + 4 * t_pad  # single-buffered

    def footprint(bb):
        rows = bb * T
        x_out = 2 * rows * c_pad * (2 + 4)            # x bf16 + out f32, double-buffered
        qkv = rows * 3 * c_pad * 2                    # bf16 qkv value
        scr = 3 * n_head * rows * hd_pad * 2          # q/k/v head-major scratch (bf16)
        attn = n_head * T * (t_pad * 6 + hd_pad * 4)  # per-b scores f32 + probs bf16 + y f32
        return weights + x_out + qkv + scr + attn

    budget = vmem_limit - (4 << 20)
    best = 1
    for d in range(1, B + 1):
        if B % d:
            continue
        if d > 1 and B // d < 2:       # keep the parallel grid >= 2 steps
            continue
        if d * T > 1024:               # enough rows to amortize; cap vreg pressure
            continue
        if footprint(d) <= budget:
            best = d
    return best


def random_causal_mha(x, w_qkv_t, w_proj_t, b_proj, perm, *, n_head, block_b=None):
    """x: (B, T, C) f32; w_qkv_t: (C, 3C); w_proj_t: (C, C); b_proj: (C,);
    perm: (T,) int permutation (mirrors torch.randperm in _mask). Returns (B, T, C)."""
    B, T, C = x.shape
    head_dim = C // n_head
    scale = 1.0 / math.sqrt(head_dim)

    vmem_limit = _vmem_limit_bytes()
    if block_b is None:
        block_b = _choose_block_b(B, T, C, n_head, head_dim, vmem_limit)
    grid = (B // block_b,)
    rows = block_b * T

    # Host-side prep: x/weights in bf16 (MXU native, half HBM traffic), the
    # 1/sqrt(head_dim) scale folded into the q columns of W_qkv.
    x_bf = x.astype(jnp.bfloat16)
    wqkv_bf = jnp.concatenate([w_qkv_t[:, :C] * scale, w_qkv_t[:, C:]],
                              axis=1).astype(jnp.bfloat16)               # (C, 3C)
    wproj_bf = w_proj_t.astype(jnp.bfloat16)                             # (C, C)
    bias2 = b_proj.reshape(1, C).astype(jnp.float32)
    perm2 = perm.reshape(1, T).astype(jnp.int32)

    kernel = functools.partial(_mha_kernel, n_head=n_head, head_dim=head_dim,
                               block_b=block_b)
    const = pl.Buffered(1)   # grid-invariant operands: no double buffer

    return pl.pallas_call(
        kernel,
        out_shape=jax.ShapeDtypeStruct((B, T, C), x.dtype),
        grid_spec=pltpu.PrefetchScalarGridSpec(
            num_scalar_prefetch=0,
            grid=grid,
            in_specs=[
                pl.BlockSpec((block_b, T, C), lambda i: (i, 0, 0)),            # x (bf16)
                pl.BlockSpec((C, 3 * C), lambda i: (0, 0), pipeline_mode=const),  # W_qkv^T
                pl.BlockSpec((C, C), lambda i: (0, 0), pipeline_mode=const),      # W_proj^T
                pl.BlockSpec((1, C), lambda i: (0, 0), pipeline_mode=const),      # bias
                pl.BlockSpec((1, T), lambda i: (0, 0), pipeline_mode=const),      # key perm
            ],
            out_specs=pl.BlockSpec((block_b, T, C), lambda i: (i, 0, 0)),
            scratch_shapes=[
                pltpu.VMEM((n_head, rows, head_dim), jnp.bfloat16),   # q (head-major)
                pltpu.VMEM((n_head, rows, head_dim), jnp.bfloat16),   # k
                pltpu.VMEM((n_head, rows, head_dim), jnp.bfloat16),   # v
            ],
        ),
        compiler_params=pltpu.CompilerParams(
            dimension_semantics=("parallel",),
            vmem_limit_bytes=vmem_limit,
        ),
    )(x_bf, wqkv_bf, wproj_bf, bias2, perm2)


def _reference(x, w_qkv_t, w_proj_t, b_proj, perm, n_head):
    """Pure-JAX f32 reference implementing the PyTorch forward exactly."""
    B, T, C = x.shape
    hd = C // n_head
    tril = jnp.tril(jnp.ones((T, T), dtype=bool))
    masked = ~tril[:, perm]
    mask = jnp.where(masked, jnp.float32(-jnp.inf), jnp.float32(0.0))
    qkv = x @ w_qkv_t
    qkv = qkv.reshape(B, T, 3, n_head, hd)
    q, k, v = qkv[:, :, 0], qkv[:, :, 1], qkv[:, :, 2]
    q, k, v = (jnp.swapaxes(t, 1, 2) for t in (q, k, v))     # (B, H, T, hd)
    s = jnp.einsum("bhqd,bhkd->bhqk", q, k) / math.sqrt(hd) + mask
    p = jax.nn.softmax(s, axis=-1)
    y = jnp.einsum("bhqk,bhkd->bhqd", p, v)
    y = jnp.swapaxes(y, 1, 2).reshape(B, T, C)
    return y @ w_proj_t + b_proj


if __name__ == "__main__":
    # Small shapes consistent with the module: C = n_head * head_dim.
    B, T, C = 2, 8, 32
    N_HEAD = 4
    DROPOUT = 0.0   # deterministic; see TODO(synk) in kernel for p > 0

    root = jax.random.PRNGKey(0)
    k_x, k_wqkv, k_wproj, k_bproj, k_perm = jax.random.split(root, 5)

    x = jax.random.normal(k_x, (B, T, C), dtype=jnp.float32)
    # nn.Linear(emb_dim, 3*emb_dim, bias=False): weight (3C, C); pass transposed.
    w_qkv = jax.random.normal(k_wqkv, (3 * C, C), dtype=jnp.float32) * (1.0 / math.sqrt(C))
    w_proj = jax.random.normal(k_wproj, (C, C), dtype=jnp.float32) * (1.0 / math.sqrt(C))
    b_proj = jax.random.normal(k_bproj, (C,), dtype=jnp.float32) * 0.01

    # Mirror of RandomCausalMHA._mask's torch.randperm(T), drawn fresh per forward.
    perm = jax.random.permutation(k_perm, T)

    out = random_causal_mha(x, w_qkv.T, w_proj.T, b_proj, perm, n_head=N_HEAD)
    out = jax.block_until_ready(out)

    ref = _reference(x, w_qkv.T, w_proj.T, b_proj, perm, N_HEAD)
    assert out.shape == (B, T, C)
    # bf16 x/q/k/v/p + approx reciprocal => looser tolerance than a pure-f32 kernel.
    assert jnp.allclose(out, ref, atol=1e-1, rtol=1e-1), (
        f"mismatch vs reference, max abs err={float(jnp.max(jnp.abs(out - ref)))}")

    print("KERNEL_OK")
</pallas_src>

<mosaic_0001>
module attributes {stable_mosaic.version = 11 : i64} {
  func.func @_mha_kernel(%arg0: i32, %arg1: memref<1x8x32xbf16, #tpu.memory_space<vmem>>, %arg2: memref<32x96xbf16, #tpu.memory_space<vmem>>, %arg3: memref<32x32xbf16, #tpu.memory_space<vmem>>, %arg4: memref<1x32xf32, #tpu.memory_space<vmem>>, %arg5: memref<1x8xi32, #tpu.memory_space<vmem>>, %arg6: memref<1x8x32xf32, #tpu.memory_space<vmem>>, %arg7: memref<4x8x8xbf16, #tpu.memory_space<vmem>>, %arg8: memref<4x8x8xbf16, #tpu.memory_space<vmem>>, %arg9: memref<4x8x8xbf16, #tpu.memory_space<vmem>>) attributes {dimension_semantics = [#tpu.dimension_semantics<parallel>], iteration_bounds = array<i64: 2>, scalar_prefetch = 0 : i64, scratch_operands = 3 : i64, tpu.core_type = #tpu.core_type<tc>, window_params = [{transform_indices = @transform_0, window_bounds = array<i64: 1, 8, 32>}, {pipeline_mode = #tpu.pipeline_mode<synchronous>, transform_indices = @transform_1, window_bounds = array<i64: 32, 96>}, {pipeline_mode = #tpu.pipeline_mode<synchronous>, transform_indices = @transform_2, window_bounds = array<i64: 32, 32>}, {pipeline_mode = #tpu.pipeline_mode<synchronous>, transform_indices = @transform_3, window_bounds = array<i64: 1, 32>}, {pipeline_mode = #tpu.pipeline_mode<synchronous>, transform_indices = @transform_4, window_bounds = array<i64: 1, 8>}, {transform_indices = @transform_5, window_bounds = array<i64: 1, 8, 32>}]} {
    %c0 = arith.constant 0 : index
    %c0_0 = arith.constant 0 : index
    %c0_1 = arith.constant 0 : index
    %0 = vector.load %arg1[%c0, %c0_0, %c0_1] : memref<1x8x32xbf16, #tpu.memory_space<vmem>>, vector<1x8x32xbf16>
    %1 = vector.shape_cast %0 : vector<1x8x32xbf16> to vector<8x32xbf16>
    %c0_2 = arith.constant 0 : index
    %c0_3 = arith.constant 0 : index
    %2 = vector.load %arg2[%c0_2, %c0_3] : memref<32x96xbf16, #tpu.memory_space<vmem>>, vector<32x96xbf16>
    %cst = arith.constant dense<0.000000e+00> : vector<8x96xf32>
    %3 = tpu.matmul %1, %2, %cst {dimension_numbers = #tpu.dot_dimension_numbers<[1], [0], [0], [1], [0, 0, 1, 1], [], []>} : vector<8x32xbf16>, vector<32x96xbf16>, vector<8x96xf32> -> vector<8x96xf32>
    %4 = arith.truncf %3 : vector<8x96xf32> to vector<8x96xbf16>
    %5 = vector.extract_strided_slice %4 {offsets = [0, 0], sizes = [8, 8], strides = [1, 1]} : vector<8x96xbf16> to vector<8x8xbf16>
    %c0_4 = arith.constant 0 : index
    %c0_5 = arith.constant 0 : index
    %c0_6 = arith.constant 0 : index
    %6 = vector.load %arg7[%c0_4, %c0_5, %c0_6] : memref<4x8x8xbf16, #tpu.memory_space<vmem>>, vector<1x8x8xbf16>
    %7 = vector.shape_cast %6 : vector<1x8x8xbf16> to vector<8x8xbf16>
    %8 = vector.shape_cast %5 : vector<8x8xbf16> to vector<1x8x8xbf16>
    tpu.vector_store %arg7[%c0_4, %c0_5, %c0_6], %8 {strides = array<i32>} : memref<4x8x8xbf16, #tpu.memory_space<vmem>>, vector<1x8x8xbf16>,
    %9 = vector.extract_strided_slice %4 {offsets = [0, 32], sizes = [8, 8], strides = [1, 1]} : vector<8x96xbf16> to vector<8x8xbf16>
    %c0_7 = arith.constant 0 : index
    %c0_8 = arith.constant 0 : index
    %c0_9 = arith.constant 0 : index
    %10 = vector.load %arg8[%c0_7, %c0_8, %c0_9] : memref<4x8x8xbf16, #tpu.memory_space<vmem>>, vector<1x8x8xbf16>
    %11 = vector.shape_cast %10 : vector<1x8x8xbf16> to vector<8x8xbf16>
    %12 = vector.shape_cast %9 : vector<8x8xbf16> to vector<1x8x8xbf16>
    tpu.vector_store %arg8[%c0_7, %c0_8, %c0_9], %12 {strides = array<i32>} : memref<4x8x8xbf16, #tpu.memory_space<vmem>>, vector<1x8x8xbf16>,
    %13 = vector.extract_strided_slice %4 {offsets = [0, 64], sizes = [8, 8], strides = [1, 1]} : vector<8x96xbf16> to vector<8x8xbf16>
    %c0_10 = arith.constant 0 : index
    %c0_11 = arith.constant 0 : index
    %c0_12 = arith.constant 0 : index
    %14 = vector.load %arg9[%c0_10, %c0_11, %c0_12] : memref<4x8x8xbf16, #tpu.memory_space<vmem>>, vector<1x8x8xbf16>
    %15 = vector.shape_cast %14 : vector<1x8x8xbf16> to vector<8x8xbf16>
    %16 = vector.shape_cast %13 : vector<8x8xbf16> to vector<1x8x8xbf16>
    tpu.vector_store %arg9[%c0_10, %c0_11, %c0_12], %16 {strides = array<i32>} : memref<4x8x8xbf16, #tpu.memory_space<vmem>>, vector<1x8x8xbf16>,
    %17 = vector.extract_strided_slice %4 {offsets = [0, 8], sizes = [8, 8], strides = [1, 1]} : vector<8x96xbf16> to vector<8x8xbf16>
    %c1 = arith.constant 1 : index
    %c0_13 = arith.constant 0 : index
    %c0_14 = arith.constant 0 : index
    %18 = vector.load %arg7[%c1, %c0_13, %c0_14] : memref<4x8x8xbf16, #tpu.memory_space<vmem>>, vector<1x8x8xbf16>
    %19 = vector.shape_cast %18 : vector<1x8x8xbf16> to vector<8x8xbf16>
    %20 = vector.shape_cast %17 : vector<8x8xbf16> to vector<1x8x8xbf16>
    tpu.vector_store %arg7[%c1, %c0_13, %c0_14], %20 {strides = array<i32>} : memref<4x8x8xbf16, #tpu.memory_space<vmem>>, vector<1x8x8xbf16>,
    %21 = vector.extract_strided_slice %4 {offsets = [0, 40], sizes = [8, 8], strides = [1, 1]} : vector<8x96xbf16> to vector<8x8xbf16>
    %c1_15 = arith.constant 1 : index
    %c0_16 = arith.constant 0 : index
    %c0_17 = arith.constant 0 : index
    %22 = vector.load %arg8[%c1_15, %c0_16, %c0_17] : memref<4x8x8xbf16, #tpu.memory_space<vmem>>, vector<1x8x8xbf16>
    %23 = vector.shape_cast %22 : vector<1x8x8xbf16> to vector<8x8xbf16>
    %24 = vector.shape_cast %21 : vector<8x8xbf16> to vector<1x8x8xbf16>
    tpu.vector_store %arg8[%c1_15, %c0_16, %c0_17], %24 {strides = array<i32>} : memref<4x8x8xbf16, #tpu.memory_space<vmem>>, vector<1x8x8xbf16>,
    %25 = vector.extract_strided_slice %4 {offsets = [0, 72], sizes = [8, 8], strides = [1, 1]} : vector<8x96xbf16> to vector<8x8xbf16>
    %c1_18 = arith.constant 1 : index
    %c0_19 = arith.constant 0 : index
    %c0_20 = arith.constant 0 : index
    %26 = vector.load %arg9[%c1_18, %c0_19, %c0_20] : memref<4x8x8xbf16, #tpu.memory_space<vmem>>, vector<1x8x8xbf16>
    %27 = vector.shape_cast %26 : vector<1x8x8xbf16> to vector<8x8xbf16>
    %28 = vector.shape_cast %25 : vector<8x8xbf16> to vector<1x8x8xbf16>
    tpu.vector_store %arg9[%c1_18, %c0_19, %c0_20], %28 {strides = array<i32>} : memref<4x8x8xbf16, #tpu.memory_space<vmem>>, vector<1x8x8xbf16>,
    %29 = vector.extract_strided_slice %4 {offsets = [0, 16], sizes = [8, 8], strides = [1, 1]} : vector<8x96xbf16> to vector<8x8xbf16>
    %c2 = arith.constant 2 : index
    %c0_21 = arith.constant 0 : index
    %c0_22 = arith.constant 0 : index
    %30 = vector.load %arg7[%c2, %c0_21, %c0_22] : memref<4x8x8xbf16, #tpu.memory_space<vmem>>, vector<1x8x8xbf16>
    %31 = vector.shape_cast %30 : vector<1x8x8xbf16> to vector<8x8xbf16>
    %32 = vector.shape_cast %29 : vector<8x8xbf16> to vector<1x8x8xbf16>
    tpu.vector_store %arg7[%c2, %c0_21, %c0_22], %32 {strides = array<i32>} : memref<4x8x8xbf16, #tpu.memory_space<vmem>>, vector<1x8x8xbf16>,
    %33 = vector.extract_strided_slice %4 {offsets = [0, 48], sizes = [8, 8], strides = [1, 1]} : vector<8x96xbf16> to vector<8x8xbf16>
    %c2_23 = arith.constant 2 : index
    %c0_24 = arith.constant 0 : index
    %c0_25 = arith.constant 0 : index
    %34 = vector.load %arg8[%c2_23, %c0_24, %c0_25] : memref<4x8x8xbf16, #tpu.memory_space<vmem>>, vector<1x8x8xbf16>
    %35 = vector.shape_cast %34 : vector<1x8x8xbf16> to vector<8x8xbf16>
    %36 = vector.shape_cast %33 : vector<8x8xbf16> to vector<1x8x8xbf16>
    tpu.vector_store %arg8[%c2_23, %c0_24, %c0_25], %36 {strides = array<i32>} : memref<4x8x8xbf16, #tpu.memory_space<vmem>>, vector<1x8x8xbf16>,
    %37 = vector.extract_strided_slice %4 {offsets = [0, 80], sizes = [8, 8], strides = [1, 1]} : vector<8x96xbf16> to vector<8x8xbf16>
    %c2_26 = arith.constant 2 : index
    %c0_27 = arith.constant 0 : index
    %c0_28 = arith.constant 0 : index
    %38 = vector.load %arg9[%c2_26, %c0_27, %c0_28] : memref<4x8x8xbf16, #tpu.memory_space<vmem>>, vector<1x8x8xbf16>
    %39 = vector.shape_cast %38 : vector<1x8x8xbf16> to vector<8x8xbf16>
    %40 = vector.shape_cast %37 : vector<8x8xbf16> to vector<1x8x8xbf16>
    tpu.vector_store %arg9[%c2_26, %c0_27, %c0_28], %40 {strides = array<i32>} : memref<4x8x8xbf16, #tpu.memory_space<vmem>>, vector<1x8x8xbf16>,
    %41 = vector.extract_strided_slice %4 {offsets = [0, 24], sizes = [8, 8], strides = [1, 1]} : vector<8x96xbf16> to vector<8x8xbf16>
    %c3 = arith.constant 3 : index
    %c0_29 = arith.constant 0 : index
    %c0_30 = arith.constant 0 : index
    %42 = vector.load %arg7[%c3, %c0_29, %c0_30] : memref<4x8x8xbf16, #tpu.memory_space<vmem>>, vector<1x8x8xbf16>
    %43 = vector.shape_cast %42 : vector<1x8x8xbf16> to vector<8x8xbf16>
    %44 = vector.shape_cast %41 : vector<8x8xbf16> to vector<1x8x8xbf16>
    tpu.vector_store %arg7[%c3, %c0_29, %c0_30], %44 {strides = array<i32>} : memref<4x8x8xbf16, #tpu.memory_space<vmem>>, vector<1x8x8xbf16>,
    %45 = vector.extract_strided_slice %4 {offsets = [0, 56], sizes = [8, 8], strides = [1, 1]} : vector<8x96xbf16> to vector<8x8xbf16>
    %c3_31 = arith.constant 3 : index
    %c0_32 = arith.constant 0 : index
    %c0_33 = arith.constant 0 : index
    %46 = vector.load %arg8[%c3_31, %c0_32, %c0_33] : memref<4x8x8xbf16, #tpu.memory_space<vmem>>, vector<1x8x8xbf16>
    %47 = vector.shape_cast %46 : vector<1x8x8xbf16> to vector<8x8xbf16>
    %48 = vector.shape_cast %45 : vector<8x8xbf16> to vector<1x8x8xbf16>
    tpu.vector_store %arg8[%c3_31, %c0_32, %c0_33], %48 {strides = array<i32>} : memref<4x8x8xbf16, #tpu.memory_space<vmem>>, vector<1x8x8xbf16>,
    %49 = vector.extract_strided_slice %4 {offsets = [0, 88], sizes = [8, 8], strides = [1, 1]} : vector<8x96xbf16> to vector<8x8xbf16>
    %c3_34 = arith.constant 3 : index
    %c0_35 = arith.constant 0 : index
    %c0_36 = arith.constant 0 : index
    %50 = vector.load %arg9[%c3_34, %c0_35, %c0_36] : memref<4x8x8xbf16, #tpu.memory_space<vmem>>, vector<1x8x8xbf16>
    %51 = vector.shape_cast %50 : vector<1x8x8xbf16> to vector<8x8xbf16>
    %52 = vector.shape_cast %49 : vector<8x8xbf16> to vector<1x8x8xbf16>
    tpu.vector_store %arg9[%c3_34, %c0_35, %c0_36], %52 {strides = array<i32>} : memref<4x8x8xbf16, #tpu.memory_space<vmem>>, vector<1x8x8xbf16>,
    %53 = tpu.iota {dimensions = array<i32: 0>} : vector<8x8xi32>
    %c0_37 = arith.constant 0 : index
    %c0_38 = arith.constant 0 : index
    %54 = vector.load %arg5[%c0_37, %c0_38] : memref<1x8xi32, #tpu.memory_space<vmem>>, vector<1x8xi32>
    %55 = vector.broadcast %54 : vector<1x8xi32> to vector<8x8xi32>
    %56 = arith.cmpi sle, %55, %53 : vector<8x8xi32>
    %57 = vector.shape_cast %56 : vector<8x8xi1> to vector<1x8x8xi1>
    %c0_39 = arith.constant 0 : index
    %c0_40 = arith.constant 0 : index
    %58 = vector.load %arg3[%c0_39, %c0_40] : memref<32x32xbf16, #tpu.memory_space<vmem>>, vector<32x32xbf16>
    %c0_41 = arith.constant 0 : index
    %c0_42 = arith.constant 0 : index
    %59 = vector.load %arg4[%c0_41, %c0_42] : memref<1x32xf32, #tpu.memory_space<vmem>>, vector<1x32xf32>
    %60 = vector.shape_cast %59 : vector<1x32xf32> to vector<1x32xf32>
    %61 = vector.broadcast %60 : vector<1x32xf32> to vector<8x32xf32>
    %cst_43 = arith.constant 0xFF800000 : f32
    %c0_i32 = arith.constant 0 : i32
    %c8_i32 = arith.constant 8 : i32
    %62 = arith.muli %c0_i32, %c8_i32 : i32
    %63 = tpu.assume_multiple %62, 8 : i32
    %c0_44 = arith.constant 0 : index
    %64 = arith.index_cast %63 : i32 to index
    %c0_45 = arith.constant 0 : index
    %65 = vector.load %arg7[%c0_44, %64, %c0_45] : memref<4x8x8xbf16, #tpu.memory_space<vmem>>, vector<4x8x8xbf16>
    %c0_46 = arith.constant 0 : index
    %66 = arith.index_cast %63 : i32 to index
    %c0_47 = arith.constant 0 : index
    %67 = vector.load %arg8[%c0_46, %66, %c0_47] : memref<4x8x8xbf16, #tpu.memory_space<vmem>>, vector<4x8x8xbf16>
    %c0_48 = arith.constant 0 : index
    %68 = arith.index_cast %63 : i32 to index
    %c0_49 = arith.constant 0 : index
    %69 = vector.load %arg9[%c0_48, %68, %c0_49] : memref<4x8x8xbf16, #tpu.memory_space<vmem>>, vector<4x8x8xbf16>
    "tpu.trace_start"() <{level = 10 : i32, message = "hqd,hkd->hqk"}> : () -> ()
    %cst_50 = arith.constant dense<0.000000e+00> : vector<4x8x8xf32>
    %70 = tpu.matmul %65, %67, %cst_50 {dimension_numbers = #tpu.dot_dimension_numbers<[2], [2], [1], [1], [0, 0, 0, 1, 1, 1], [0], [0]>} : vector<4x8x8xbf16>, vector<4x8x8xbf16>, vector<4x8x8xf32> -> vector<4x8x8xf32>
    "tpu.trace_stop"() : () -> ()
    %71 = vector.shape_cast %57 : vector<1x8x8xi1> to vector<1x8x8xi1>
    %72 = vector.broadcast %71 : vector<1x8x8xi1> to vector<4x8x8xi1>
    %73 = vector.broadcast %cst_43 : f32 to vector<4x8x8xf32>
    %74 = arith.select %72, %70, %73 : vector<4x8x8xi1>, vector<4x8x8xf32>
    %cst_51 = arith.constant dense<0xFF800000> : vector<4x8xf32>
    %75 = vector.multi_reduction <maximumf>, %74, %cst_51 [2] : vector<4x8x8xf32> to vector<4x8xf32>
    %76 = vector.shape_cast %75 : vector<4x8xf32> to vector<4x8x1xf32>
    %77 = vector.broadcast %76 : vector<4x8x1xf32> to vector<4x8x8xf32>
    %78 = arith.subf %74, %77 : vector<4x8x8xf32>
    %79 = math.exp %78 : vector<4x8x8xf32>
    %cst_52 = arith.constant dense<0.000000e+00> : vector<4x8xf32>
    %80 = vector.multi_reduction <add>, %79, %cst_52 [2] : vector<4x8x8xf32> to vector<4x8xf32>
    %81 = vector.shape_cast %80 : vector<4x8xf32> to vector<4x8x1xf32>
    %82 = arith.truncf %79 : vector<4x8x8xf32> to vector<4x8x8xbf16>
    "tpu.trace_start"() <{level = 10 : i32, message = "hqk,hkd->hqd"}> : () -> ()
    %cst_53 = arith.constant dense<0.000000e+00> : vector<4x8x8xf32>
    %83 = tpu.matmul %82, %69, %cst_53 {dimension_numbers = #tpu.dot_dimension_numbers<[2], [1], [1], [2], [0, 0, 0, 1, 1, 2], [0], [0]>} : vector<4x8x8xbf16>, vector<4x8x8xbf16>, vector<4x8x8xf32> -> vector<4x8x8xf32>
    "tpu.trace_stop"() : () -> ()
    %84 = tpu.reciprocal %81 {approx = true} : vector<4x8x1xf32> -> vector<4x8x1xf32>
    %85 = vector.broadcast %84 : vector<4x8x1xf32> to vector<4x8x8xf32>
    %86 = arith.mulf %83, %85 : vector<4x8x8xf32>
    %87 = vector.extract_strided_slice %86 {offsets = [0, 0, 0], sizes = [1, 8, 8], strides = [1, 1, 1]} : vector<4x8x8xf32> to vector<1x8x8xf32>
    %88 = vector.shape_cast %87 : vector<1x8x8xf32> to vector<8x8xf32>
    %89 = vector.extract_strided_slice %86 {offsets = [1, 0, 0], sizes = [1, 8, 8], strides = [1, 1, 1]} : vector<4x8x8xf32> to vector<1x8x8xf32>
    %90 = vector.shape_cast %89 : vector<1x8x8xf32> to vector<8x8xf32>
    %91 = vector.extract_strided_slice %86 {offsets = [2, 0, 0], sizes = [1, 8, 8], strides = [1, 1, 1]} : vector<4x8x8xf32> to vector<1x8x8xf32>
    %92 = vector.shape_cast %91 : vector<1x8x8xf32> to vector<8x8xf32>
    %93 = vector.extract_strided_slice %86 {offsets = [3, 0, 0], sizes = [1, 8, 8], strides = [1, 1, 1]} : vector<4x8x8xf32> to vector<1x8x8xf32>
    %94 = vector.shape_cast %93 : vector<1x8x8xf32> to vector<8x8xf32>
    %95 = tpu.concatenate %88, %90, %92, %94 in 1 : vector<8x8xf32>, vector<8x8xf32>, vector<8x8xf32>, vector<8x8xf32> -> vector<8x32xf32>
    %96 = arith.truncf %95 : vector<8x32xf32> to vector<8x32xbf16>
    %cst_54 = arith.constant dense<0.000000e+00> : vector<8x32xf32>
    %97 = tpu.matmul %96, %58, %cst_54 {dimension_numbers = #tpu.dot_dimension_numbers<[1], [0], [0], [1], [0, 0, 1, 1], [], []>} : vector<8x32xbf16>, vector<32x32xbf16>, vector<8x32xf32> -> vector<8x32xf32>
    %98 = arith.addf %97, %61 : vector<8x32xf32>
    %99 = arith.index_cast %c0_i32 : i32 to index
    %c0_55 = arith.constant 0 : index
    %c0_56 = arith.constant 0 : index
    %100 = vector.load %arg6[%99, %c0_55, %c0_56] : memref<1x8x32xf32, #tpu.memory_space<vmem>>, vector<1x8x32xf32>
    %101 = vector.shape_cast %100 : vector<1x8x32xf32> to vector<8x32xf32>
    %102 = vector.shape_cast %98 : vector<8x32xf32> to vector<1x8x32xf32>
    tpu.vector_store %arg6[%99, %c0_55, %c0_56], %102 {strides = array<i32>} : memref<1x8x32xf32, #tpu.memory_space<vmem>>, vector<1x8x32xf32>,
    %c1_i32 = arith.constant 1 : i32
    return
  }
  func.func @transform_0(%arg0: i32) -> (i32, i32, i32) {
    %c0_i32 = arith.constant 0 : i32
    %c0_i32_0 = arith.constant 0 : i32
    %c0_i32_1 = arith.constant 0 : i32
    return %arg0, %c0_i32, %c0_i32_0 : i32, i32, i32
  }
  func.func @transform_1(%arg0: i32) -> (i32, i32) {
    %c0_i32 = arith.constant 0 : i32
    %c0_i32_0 = arith.constant 0 : i32
    %c0_i32_1 = arith.constant 0 : i32
    return %c0_i32, %c0_i32_0 : i32, i32
  }
  func.func @transform_2(%arg0: i32) -> (i32, i32) {
    %c0_i32 = arith.constant 0 : i32
    %c0_i32_0 = arith.constant 0 : i32
    %c0_i32_1 = arith.constant 0 : i32
    return %c0_i32, %c0_i32_0 : i32, i32
  }
  func.func @transform_3(%arg0: i32) -> (i32, i32) {
    %c0_i32 = arith.constant 0 : i32
    %c0_i32_0 = arith.constant 0 : i32
    %c0_i32_1 = arith.constant 0 : i32
    return %c0_i32, %c0_i32_0 : i32, i32
  }
  func.func @transform_4(%arg0: i32) -> (i32, i32) {
    %c0_i32 = arith.constant 0 : i32
    %c0_i32_0 = arith.constant 0 : i32
    %c0_i32_1 = arith.constant 0 : i32
    return %c0_i32, %c0_i32_0 : i32, i32
  }
  func.func @transform_5(%arg0: i32) -> (i32, i32, i32) {
    %c0_i32 = arith.constant 0 : i32
    %c0_i32_0 = arith.constant 0 : i32
    %c0_i32_1 = arith.constant 0 : i32
    return %arg0, %c0_i32, %c0_i32_0 : i32, i32, i32
  }
}

</mosaic_0001>

<bundles_post_ra>
// kernel: tpu_custom_call.1
= control target key start
LH: loop header
LB: loop body
LE: loop exit
PB: predicated region body
PF: predicated region fallthrough
CT: control target
= control target key end

     0   :  { %10 = vsyncpa [#allocation6], 0  ;;  %s1315_s0 = inlined_call_operand.hbm [shape: bf16[2,8,32], index: 0, kind: input, shape index: {}]   ;;  %s1316_s1 = inlined_call_operand.hbm [shape: bf16[32,96], index: 1, kind: input, shape index: {}]   ;;  %s1317_s2 = inlined_call_operand.hbm [shape: bf16[32,32], index: 2, kind: input, shape index: {}]   ;;  %s1318_s3 = inlined_call_operand.vmem [shape: f32[1,32], index: 3, kind: input, shape index: {}]   ;;  %s1319_s4 = inlined_call_operand.vmem [shape: s32[1,8], index: 4, kind: input, shape index: {}]   ;;  %s1320_s5 = inlined_call_operand.hbm [shape: f32[2,8,32], index: 5, kind: output, shape index: {}]  }
   0x1   :  { %12 = vsyncpa [#allocation6 + $0x1], 0 }
   0x2   :  { %13 = vsyncpa [#allocation9], 0 }
   0x3   :  { %14 = vsyncpa [#allocation7], 0 }
   0x4   :  { %16 = vsyncpa [#allocation7 + $0x1], 0  ;;  %s1109_s18 = smov 0   ;;  %s1111_s19 = smov 0  }
   0x5   :  { %s1113_s20 = smov 0   ;;  %s1115_s21 = smov 0  }
   0x6 LB: > { %s174_s24 = sshll.u32 %s1316_s1, 4  ;;  %s1133_s25 = sadd.s32 4294967295, %s1059_s21   ;;  %s1059_s21 = sphi %s1115_s21, %s1331_s21   ;;  %s1055_s20 = sphi %s1113_s20, %s1330_s20   ;;  %s1051_s19 = sphi %s1111_s19, %s1329_s19   ;;  %s1047_s18 = sphi %s1109_s18, %s1328_s18   ;;  %s175_s24 = int_to_ptr.hbm [resolvable:$true] %s174_s24 }
   0x7   : > { %p753_p0 = scmp.ge.s32.totalorder %s1059_s21, 1  ;;  %p43_p1 = scmp.eq.s32.totalorder %s1133_s25, 0 }
   0x8   : > { %p163_p2 = scmp.lt.s32.totalorder %s1059_s21, 3  ;;  %s1061_s27 = smov [#allocation8]  }
   0x9   : > { %s176_s28 = sshll.u32 %s1061_s27, 4  ;;  %s188_s6 = sshll.u32 %s1317_s2, 4  ;;  %s177_s28 = int_to_ptr.vmem [resolvable:$true] %s176_s28  ;;  %s189_s6 = int_to_ptr.hbm [resolvable:$true] %s188_s6 }
   0xa   : > { %p1138_p3 = pnand %p753_p0, %p163_p2  ;;  %s1062_s7 = smov [#allocation10]  }
   0xb   : > { %s190_s8 = sshll.u32 %s1062_s7, 4  ;;  %s1063_s9 = smov 64   ;;  %s191_s8 = int_to_ptr.vmem [resolvable:$true] %s190_s8 }
   0xc   : > { %p810_p4 = pneg %p1138_p3  ;;  %s1064_s10 = smov 4  }
   0xd   : > { %s752_s11 = sadd.s32 4294967294, %s1059_s21   ;;  %s1152_s12 = sadd.s32 1, %s1059_s21  }
   0xe   : > { %p811_p6 = pnand %p810_p4, %p43_p1  ;;  %s26_s13 = ssub.s32 %s1059_s21, %s1152_s12 }
   0xf   : > { %s29_s14 = sadd.s32 1, %s1055_s20  ;;  %p27_p7 = scmp.eq.s32.totalorder %s26_s13, 0 }
  0x10   : > { %813 = dma.hbm_to_vmem [thread:$0]  (!%p811_p6), %s175_s24, 256, %s177_s28, [#allocation9], %s1063_s9, %s1063_s9, %s1064_s10  }
  0x11   : > { %816 = dma.hbm_to_vmem [thread:$0]  (!%p811_p6), %s189_s6, 256, %s191_s8, [#allocation9], %s1063_s9, %s1063_s9, %s1064_s10  }
  0x12   : > { %p36_p8 = scmp.ne.s32.totalorder %s1055_s20, %s1051_s19  ;;  %p37_p9 = scmp.eq.s32.totalorder %s1059_s21, 0 }
  0x13   : > { %p42_p10 = scmp.ne.s32.totalorder %s1051_s19, %s1047_s18  ;;  %p150_p13 = scmp.eq.s32.totalorder %s1133_s25, 1 }
  0x14   : > { %s1163_s15 = scalar_select %p27_p7, %s1055_s20, %s29_s14  }
  0x15   : > { %p1165_p11 = por %p37_p9, %p36_p8  ;;  %p1171_p12 = por %p43_p1, %p42_p10 }
  0x16   : > { %p156_p0 = scmp.eq.s32.totalorder %s752_s11, 1  ;;  %p827_p2 = scmp.lt.s32.totalorder %s1059_s21, 2 }
  0x17   : > { %s210_s22 = sand.u32 1, %s1055_s20   ;;  %p1178_p4 = por %p150_p13, %p36_p8 }
  0x18   : > { %p1182_p6 = por %p156_p0, %p42_p10  ;;  %s757_s27 = sshll.u32 %s210_s22, 2 }
  0x19   : > { %s758_s28 = sshll.u32 %s1059_s21, 2  ;;  %s214_s7 = scalar_lea.vmem [#allocation5], %s757_s27 }
  0x1a   : > { %s218_s6 = scalar_lea.hbm %s1315_s0, %s758_s28  ;;  %s222_s8 = sshll.u32 %s214_s7, 4  ;;  %s223_s8 = int_to_ptr.vmem [resolvable:$true] %s222_s8 }
  0x1b   : > { %s220_s9 = sshll.u32 %s218_s6, 4  ;;  %p1192_p7 = pnand %p827_p2, %p1165_p11  ;;  %s221_s9 = int_to_ptr.hbm [resolvable:$true] %s220_s9 }
  0x1c   : > { %s211_s11 = scalar_lea.sflag [#allocation6], %s210_s22  ;;  %s959_s13 = sshra.s32 %s221_s9, 4  ;;  %s960_s13 = int_to_ptr.hbm [resolvable:$true] %s959_s13 }
  0x1d   : > { %s961_s14 = scalar_lea.hbm %s960_s13, 4  ;;  %p963_p9 = pneg %p1192_p7 }
  0x1e   : > { %p962_p8 = scmp.ne.s32.totalorder %s960_s13, %s961_s14  ;;  %s966_s29 = scalar_lea.hbm %s1315_s0, 8 }
  0x1f   : > { %p967_p11 = scmp.lt.s32.totalorder %s960_s13, %s1315_s0  ;;  %p968_p0 = scmp.lt.s32.totalorder %s966_s29, %s961_s14 }
  0x20   : > { %p964_p10 = pnand %p963_p9, %p962_p8 }
  0x21   : > { %p969_p2 = por %p968_p0, %p967_p11 }
  0x22   : > { %p965_p13 = pneg %p964_p10 }
  0x24   : > { %p970_p5 = pnand %p969_p2, %p965_p13 }
  0x26   : > { %973 = shalt.err (!%p970_p5)
}
  0x27   : > { %820 = dma.hbm_to_vmem [thread:$0]  (!%p1192_p7), %s221_s9, 64, %s223_s8, %s211_s11  }
  0x28   : > { %231 = sbr.rel (%p1138_p3) target bundleno = 974 (0x3ce), region = 40  ;;  %s1209_s22 = sand.u32 (!%p1138_p3), 1, %s1051_s19  }
  0x29   : > { %s760_s6 = sshll.u32 (!%p1138_p3), %s1209_s22, 2  ;;  %s234_s7 = scalar_lea.sflag (!%p1138_p3), [#allocation6], %s1209_s22 }
  0x2a   : > { %s237_s27 = scalar_lea.vmem (!%p1138_p3), [#allocation5], %s760_s6 }
  0x2d   : > { %1034 = dma.done.wait (%p1171_p12), %s234_s7, 64  }
  0x2e   : > { %1036 = vsyncadd (%p1171_p12), %s234_s7, 4294967232 }
  0x2f   : > { %1038 = dma.done.wait (%p43_p1), [#allocation9], 512  }
  0x30   : > { %1040 = vsyncadd (%p43_p1), [#allocation9], 4294966784  ;;  %v795_v0 = vld [vmem:[#allocation8 + $0x8] sm:$0xff]  ;;  %v794_v1 = vld [vmem:[#allocation8] sm:$0xff]  ;;  %vm293_vm0 = vcmask 261120   ;;  %vm311_vm1 = vcmask 60416   ;;  %v367_v31 = vlaneseq }
  0x31   : > { %303 = vmatpush.bf16.msra.mxu0 %v795_v0  ;;  %v276_v2 = vld [vmem:[%s237_s27] sm:$0xf]  ;;  %s1065_s26 = smov 72   ;;  %s1066_s17 = smov 120   ;;  %vm392_vm2 = vcmask 64512   ;;  %vm518_vm3 = vcmask 1043456  }
  0x32   : > { %s1067_s8 = smov 88   ;;  %s1068_s9 = smov 104   ;;  %v368_v32 = vshrl.u32 %v367_v31, 7  ;;  %v881_v33 = vld [vmem:[%s1319_s4] ss:$0 sm:$0xff]  ;;  %vm613_vm5 = vcmask 130048  }
  0x33   : > { %s1069_s10 = smov 112   ;;  %s1070_s11 = smov 80   ;;  %vm615_vm6 = vcmask 195584  }
  0x34   : > { %s1071_s13 = smov 96   ;;  %s1072_s14 = smov 56   ;;  %vm371_vm4 = vcmp.le.s32.totalorder %v881_v33, %v368_v32  ;;  %v797_v33 = vld [vmem:[#allocation10 + $0x8] sm:$0xff] }
  0x35   : > { %304 = vmatpush.bf16.msra.mxu0 %v794_v1  ;;  %s1073_s28 = smov 48   ;;  %s1074_s16 = smov 40  }
  0x36   : > { %s1075_s6 = smov 64   ;;  %s1076_s7 = smov 8  }
  0x37   : > { %s1077_s27 = smov 16  }
  0x38   : > { %772 = vmatmul.msk.bf16.vlgmr.msra.gmra.mxu0 %vm293_vm0, %v276_v2 }
  0xb5   : > { %v306_v3 = vpop.f32.mrf.mxu0 }
  0xb6   : > { %v1222_v4 = vpack.c.bf16 %v306_v3, %v306_v3 }
  0xb8   : > { %357 = vrot.lane.b32.xlu2 %v1222_v4, %s1065_s26  ;;  %322 = vrot.lane.b32.xlu1 %v1222_v4, %s1066_s17  ;;  %312 = vst.msk [vmem:[#allocation2] sm:$0xf] %vm311_vm1, %v1222_v4  ;;  %s1078_s26 = smov 24   ;;  %s791_s17 = sshll.u32 %s1133_s25, 3 }
  0xb9   : > { %327 = vrot.lane.b32.xlu0 %v1222_v4, %s1067_s8  ;;  %s763_s8 = sshll.u32 %s1209_s22, 3  ;;  %s648_s25 = scalar_lea.sflag [#allocation7], %s1209_s22 }
  0xbd   : > { %v308_v5 = vpop.f32.mrf.mxu0 }
  0xbf   : > { %v380_v26 = vld [vmem:[#allocation2] sm:$0xf] }
  0xc0   : > { %352 = vrot.lane.b32.xlu2 %v1222_v4, %s1068_s9  ;;  %337 = vrot.lane.b32.xlu1 %v1222_v4, %s1069_s10 }
  0xc1   : > { %342 = vrot.lane.b32.xlu0 %v1222_v4, %s1070_s11  ;;  %s658_s11 = scalar_lea.hbm %s1320_s5, %s791_s17 }
  0xc2   : > { %s662_s30 = sshll.u32 %s658_s11, 4  ;;  %s663_s30 = int_to_ptr.hbm [resolvable:$true] %s662_s30 }
  0xc9   : > { %314 = vrot.lane.b32.xlu0 %v1222_v4, %s1071_s13 }
  0xd1   : > { %332 = vrot.lane.b32.xlu0 %v1222_v4, %s1072_s14 }
  0xd9   : > { %347 = vrot.lane.b32.xlu0 %v1222_v4, %s1073_s28  ;;  %s274_s28 = scalar_lea.vmem [#allocation11], %s763_s8 }
  0xda   : > { %s660_s29 = sshll.u32 %s274_s28, 4  ;;  %s661_s29 = int_to_ptr.vmem [resolvable:$true] %s660_s29 }
 0x112   : > { %v358_v6 = vpop.permute.xlu2 %357 }
 0x113   : > { %361 = vst.msk [vmem:[#allocation3 + $0xc] sm:$0xf] %vm311_vm1, %v358_v6 }
 0x11a   : > { %v353_v7 = vpop.permute.xlu2 %352  ;;  %v387_v8 = vld [vmem:[#allocation3 + $0xc] sm:$0xf] }
 0x11b   : > { %356 = vst.msk [vmem:[#allocation2 + $0xc] sm:$0xf] %vm311_vm1, %v353_v7  ;;  %v454_v9 = vsel %vm392_vm2, %v387_v8, 0 }
 0x11c   : > { %463 = vmatpush.bf16.xpose.msrb.mxu0 %v454_v9 }
 0x122   : > { %v383_v10 = vld [vmem:[#allocation2 + $0xc] sm:$0xf] }
 0x123   : > { %776 = vmatmul.msk.bf16.vlgmr.msrb.gmra.mxu0 %vm392_vm2, %v383_v10 }
 0x12a   : > { %v323_v11 = vpop.permute.xlu1 %322 }
 0x12b   : > { %326 = vst.msk [vmem:[#allocation2 + $0x4] sm:$0xf] %vm311_vm1, %v323_v11  ;;  %v328_v12 = vpop.permute.xlu0 %327 }
 0x12c   : > { %331 = vst.msk [vmem:[#allocation3 + $0x4] sm:$0xf] %vm311_vm1, %v328_v12 }
 0x132   : > { %v338_v13 = vpop.permute.xlu1 %337  ;;  %v381_v18 = vld [vmem:[#allocation2 + $0x4] sm:$0xf] }
 0x133   : > { %341 = vst.msk [vmem:[#allocation2 + $0x8] sm:$0xf] %vm311_vm1, %v338_v13  ;;  %v343_v14 = vpop.permute.xlu0 %342  ;;  %v385_v15 = vld [vmem:[#allocation3 + $0x4] sm:$0xf] }
 0x134   : > { %346 = vst.msk [vmem:[#allocation3 + $0x8] sm:$0xf] %vm311_vm1, %v343_v14  ;;  %v416_v16 = vsel %vm392_vm2, %v385_v15, 0 }
 0x135   : > { %425 = vmatpush.bf16.xpose.msra.mxu2 %v416_v16 }
 0x13a   : > { %v382_v22 = vld [vmem:[#allocation2 + $0x8] sm:$0xf] }
 0x13b   : > { %v315_v17 = vpop.permute.xlu0 %314  ;;  %v386_v19 = vld [vmem:[#allocation3 + $0x8] sm:$0xf] }
 0x13c   : > { %317 = vst.msk [vmem:[#allocation3] sm:$0xf] %vm311_vm1, %v315_v17  ;;  %774 = vmatmul.msk.bf16.vlgmr.msra.gmra.mxu2 %vm392_vm2, %v381_v18  ;;  %v435_v20 = vsel %vm392_vm2, %v386_v19, 0 }
 0x13d   : > { %444 = vmatpush.bf16.xpose.msra.mxu3 %v435_v20 }
 0x143   : > { %v333_v21 = vpop.permute.xlu0 %332  ;;  %v384_v23 = vld [vmem:[#allocation3] sm:$0xf] }
 0x144   : > { %336 = vst.msk [vmem:[#allocation4 + $0x4] sm:$0xf] %vm311_vm1, %v333_v21  ;;  %775 = vmatmul.msk.bf16.vlgmr.msra.gmra.mxu3 %vm392_vm2, %v382_v22  ;;  %v397_v24 = vsel %vm392_vm2, %v384_v23, 0 }
 0x145   : > { %406 = vmatpush.bf16.xpose.msra.mxu1 %v397_v24 }
 0x14b   : > { %v348_v25 = vpop.permute.xlu0 %347  ;;  %v389_v27 = vld [vmem:[#allocation4 + $0x4] sm:$0xf] }
 0x14c   : > { %351 = vst.msk [vmem:[#allocation4 + $0x8] sm:$0xf] %vm311_vm1, %v348_v25  ;;  %773 = vmatmul.msk.bf16.vlgmr.msra.gmra.mxu1 %vm392_vm2, %v380_v26  ;;  %v539_v28 = vsel %vm518_vm3, %v389_v27, 0 }
 0x14d   : > { %548 = vmatpush.bf16.msrb.mxu2 %v539_v28 }
 0x153   : > { %v390_v29 = vld [vmem:[#allocation4 + $0x8] sm:$0xf] }
 0x154   : > { %v558_v30 = vsel %vm518_vm3, %v390_v29, 0 }
 0x155   : > { %567 = vmatpush.bf16.msrb.mxu3 %v558_v30 }
 0x1a0   : > { %v465_v34 = vpop.f32.mrf.mxu0 }
 0x1a1   : > { %v474_v35 = vsel %vm371_vm4, %v465_v34, -inf  ;;  %v796_v34 = vld [vmem:[#allocation10] sm:$0xff] }
 0x1a2   : > { %v484_v36 = vsel %vm392_vm2, %v474_v35, -inf }
 0x1a3   : > { %485 = vmax.xlane.f32.xlu0 %v484_v36 }
 0x1a8   : > { %v467_v37 = vpop.f32.mrf.mxu0 }
 0x1bf   : > { %v427_v38 = vpop.f32.mrf.mxu2 }
 0x1c0   : > { %v472_v39 = vsel %vm371_vm4, %v427_v38, -inf }
 0x1c1   : > { %v478_v40 = vsel %vm392_vm2, %v472_v39, -inf }
 0x1c2   : > { %479 = vmax.xlane.f32.xlu1 %v478_v40 }
 0x1c7   : > { %v429_v41 = vpop.f32.mrf.mxu2  ;;  %v446_v42 = vpop.f32.mrf.mxu3 }
 0x1c8   : > { %v473_v43 = vsel %vm371_vm4, %v446_v42, -inf }
 0x1c9   : > { %v408_v44 = vpop.f32.mrf.mxu1  ;;  %v481_v45 = vsel %vm392_vm2, %v473_v43, -inf }
 0x1ca   : > { %v471_v46 = vsel %vm371_vm4, %v408_v44, -inf  ;;  %482 = vmax.xlane.f32.xlu2 %v481_v45  ;;  %v882_v45 = vld [vmem:[%s1318_s3] ss:$0 sm:$0xff] }
 0x1cb   : > { %v475_v47 = vsel %vm392_vm2, %v471_v46, -inf }
 0x1cc   : > { %476 = vmax.xlane.f32.xlu1 %v475_v47 }
 0x1cf   : > { %v448_v48 = vpop.f32.mrf.mxu3 }
 0x1d1   : > { %v410_v49 = vpop.f32.mrf.mxu1 }
 0x1e2   : > { %362 = vrot.lane.b32.xlu2 %v1222_v4, %s1074_s16  ;;  %s1003_s16 = sshra.s32 %s663_s30, 4  ;;  %s1004_s16 = int_to_ptr.hbm [resolvable:$true] %s1003_s16 }
 0x1e3   : > { %p1010_p12 = scmp.lt.s32.totalorder %s1004_s16, %s1320_s5 }
 0x1e5   : > { %318 = vrot.lane.b32.xlu1 %v1222_v4, %s1075_s6  ;;  %s1005_s6 = scalar_lea.hbm %s1004_s16, 8 }
 0x1e6   : > { %p1006_p1 = scmp.ne.s32.totalorder %s1004_s16, %s1005_s6 }
 0x1e8   : > { %p1007_p3 = pnand %p1006_p1, %p1178_p4 }
 0x1ea   : > { %p1008_p5 = pneg %p1007_p3 }
 0x216   : > { %v486_v50 = vpop.xlane.xlu0 %485 }
 0x217   : > { %v490_v51 = vsub.f32 %v474_v35, %v486_v50 }
 0x219   : > { %v497_v52 = vmul.f32 1.442695, %v490_v51 }
 0x21b   : > { %883 = vpow2.f32 %v497_v52 }
 0x221   : > { %v884_v53 = vpop.eup %883 }
 0x222   : > { %v508_v54 = vsel %vm392_vm2, %v884_v53, 0.0  ;;  %v514_v11 = vpack.c.bf16 %v884_v53, %v884_v53 }
 0x223   : > { %509 = vadd.xlane.f32.xlu0 %v508_v54 }
 0x235   : > { %v480_v55 = vpop.xlane.xlu1 %479 }
 0x236   : > { %v488_v56 = vsub.f32 %v472_v39, %v480_v55 }
 0x238   : > { %v493_v57 = vmul.f32 1.442695, %v488_v56 }
 0x23a   : > { %885 = vpow2.f32 %v493_v57 }
 0x23d   : > { %v483_v58 = vpop.xlane.xlu2 %482 }
 0x23e   : > { %v489_v59 = vsub.f32 %v473_v43, %v483_v58 }
 0x23f   : > { %v477_v60 = vpop.xlane.xlu1 %476 }
 0x240   : > { %v886_v61 = vpop.eup %885  ;;  %v495_v62 = vmul.f32 1.442695, %v489_v59  ;;  %v487_v63 = vsub.f32 %v471_v46, %v477_v60 }
 0x241   : > { %v502_v0 = vsel %vm392_vm2, %v886_v61, 0.0  ;;  %v512_v1 = vpack.c.bf16 %v886_v61, %v886_v61 }
 0x242   : > { %887 = vpow2.f32 %v495_v62  ;;  %v491_v2 = vmul.f32 1.442695, %v487_v63  ;;  %503 = vadd.xlane.f32.xlu2 %v502_v0 }
 0x243   : > { %778 = vmatmul.msk.bf16.vlgmr.msrb.gmra.mxu2 %vm392_vm2, %v512_v1 }
 0x244   : > { %889 = vpow2.f32 %v491_v2 }
 0x245   : > { %v363_v3 = vpop.permute.xlu2 %362 }
 0x246   : > { %366 = vst.msk [vmem:[#allocation4 + $0xc] sm:$0xf] %vm311_vm1, %v363_v3 }
 0x248   : > { %v888_v4 = vpop.eup %887 }
 0x249   : > { %v505_v5 = vsel %vm392_vm2, %v888_v4, 0.0  ;;  %v513_v6 = vpack.c.bf16 %v888_v4, %v888_v4 }
 0x24a   : > { %v890_v7 = vpop.eup %889  ;;  %506 = vadd.xlane.f32.xlu0 %v505_v5 }
 0x24b   : > { %779 = vmatmul.msk.bf16.vlgmr.msrb.gmra.mxu3 %vm392_vm2, %v513_v6  ;;  %v499_v8 = vsel %vm392_vm2, %v890_v7, 0.0  ;;  %v511_v15 = vpack.c.bf16 %v890_v7, %v890_v7 }
 0x24c   : > { %500 = vadd.xlane.f32.xlu1 %v499_v8 }
 0x24d   : > { %v391_v9 = vld [vmem:[#allocation4 + $0xc] sm:$0xf] }
 0x24e   : > { %v577_v10 = vsel %vm518_vm3, %v391_v9, 0 }
 0x24f   : > { %586 = vmatpush.bf16.msra.mxu0 %v577_v10 }
 0x252   : > { %780 = vmatmul.msk.bf16.vlgmr.msra.gmra.mxu0 %vm392_vm2, %v514_v11 }
 0x257   : > { %v319_v12 = vpop.permute.xlu1 %318 }
 0x258   : > { %321 = vst.msk [vmem:[#allocation4] sm:$0xf] %vm311_vm1, %v319_v12 }
 0x25f   : > { %v388_v13 = vld [vmem:[#allocation4] sm:$0xf] }
 0x260   : > { %v520_v14 = vsel %vm518_vm3, %v388_v13, 0 }
 0x261   : > { %529 = vmatpush.bf16.msrb.mxu1 %v520_v14 }
 0x264   : > { %777 = vmatmul.msk.bf16.vlgmr.msrb.gmra.mxu1 %vm392_vm2, %v511_v15 }
 0x265   : > { %639 = vmatpush.bf16.msra.mxu1 %v797_v33 }
 0x269   : > { %640 = vmatpush.bf16.msra.mxu1 %v796_v34 }
 0x296   : > { %v510_v16 = vpop.xlane.xlu0 %509 }
 0x2b5   : > { %v504_v17 = vpop.xlane.xlu2 %503 }
 0x2b6   : > { %891 = vrcp.f32 %v504_v17 }
 0x2bc   : > { %v892_v19 = vpop.eup %891 }
 0x2bd   : > { %v507_v18 = vpop.xlane.xlu0 %506 }
 0x2be   : > { %893 = vrcp.f32 %v507_v18 }
 0x2bf   : > { %895 = vrcp.f32 %v510_v16  ;;  %v501_v35 = vpop.xlane.xlu1 %500 }
 0x2c0   : > { %897 = vrcp.f32 %v501_v35 }
 0x2c4   : > { %v894_v22 = vpop.eup %893 }
 0x2c5   : > { %v896_v25 = vpop.eup %895 }
 0x2c6   : > { %v550_v20 = vpop.f32.mrf.mxu2  ;;  %v898_v37 = vpop.eup %897 }
 0x2c7   : > { %v597_v21 = vmul.f32 %v892_v19, %v550_v20 }
 0x2c9   : > { %601 = vrot.lane.b32.xlu0 %v597_v21, %s1076_s7 }
 0x2ce   : > { %v552_v23 = vpop.f32.mrf.mxu2  ;;  %v569_v24 = vpop.f32.mrf.mxu3 }
 0x2cf   : > { %v598_v26 = vmul.f32 %v894_v22, %v569_v24  ;;  %v588_v27 = vpop.f32.mrf.mxu0 }
 0x2d0   : > { %v599_v28 = vmul.f32 %v896_v25, %v588_v27 }
 0x2d1   : > { %605 = vrot.lane.b32.xlu0 %v598_v26, %s1077_s27 }
 0x2d2   : > { %609 = vrot.lane.b32.xlu2 %v599_v28, %s1078_s26  ;;  %s1009_s26 = scalar_lea.hbm %s1320_s5, 16 }
 0x2d3   : > { %p1011_p7 = scmp.lt.s32.totalorder %s1009_s26, %s1005_s6 }
 0x2d5   : > { %p1012_p8 = por %p1011_p7, %p1010_p12 }
 0x2d6   : > { %v571_v29 = vpop.f32.mrf.mxu3 }
 0x2d7   : > { %v590_v30 = vpop.f32.mrf.mxu0  ;;  %p1013_p9 = pnand %p1012_p8, %p1008_p5 }
 0x2e1   : > { %v531_v31 = vpop.f32.mrf.mxu1 }
 0x2e2   : > { %v596_v38 = vmul.f32 %v898_v37, %v531_v31 }
 0x2e9   : > { %v533_v32 = vpop.f32.mrf.mxu1 }
 0x32c   : > { %v610_v41 = vpop.permute.xlu2 %609 }
 0x33b   : > { %v602_v36 = vpop.permute.xlu0 %601 }
 0x33c   : > { %v612_v39 = vsel %vm392_vm2, %v596_v38, %v602_v36 }
 0x343   : > { %v606_v40 = vpop.permute.xlu0 %605 }
 0x344   : > { %v614_v42 = vsel %vm613_vm5, %v612_v39, %v606_v40 }
 0x345   : > { %v616_v43 = vsel %vm615_vm6, %v614_v42, %v610_v41 }
 0x346   : > { %v617_v44 = vpack.c.bf16 %v616_v43, %v616_v43 }
 0x348   : > { %789 = vmatmul.msk.bf16.vlgmr.msra.gmra.mxu1 %vm293_vm0, %v617_v44 }
 0x3c5   : > { %v642_v46 = vpop.f32.mrf.mxu1 }
 0x3c6   : > { %v643_v47 = vadd.f32 %v882_v45, %v642_v46 }
 0x3c8   : > { %646 = vst.msk [vmem:[%s274_s28] sm:$0xff] %vm293_vm0, %v643_v47 }
 0x3c9   : > { %1016 = shalt.err (!%p1013_p9)
}
 0x3ca   : > { %808 = dma.vmem_to_hbm [thread:$0]  (%p1178_p4), %s661_s29, 128, %s663_s30, %s648_s25  }
 0x3cd   : > { %v644_v48 = vpop.f32.mrf.mxu1 }
 0x3ce PF: > { %s674_s22 = sand.u32 1, %s1047_s18   ;;  %p1327_p10 = scmp.ge.s32.totalorder %s1059_s21, 2 }
 0x3cf   : > { %s675_s9 = scalar_lea.sflag [#allocation7], %s674_s22 }
 0x3d0   : > { %p822_p13 = pnand %p1327_p10, %p1182_p6 }
 0x3d2   : > { %p823_p11 = pneg %p822_p13 }
 0x3d4   : > { %1042 = dma.done.wait (%p823_p11), %s675_s9, 128  }
 0x3d5   : > { %1044 = vsyncadd (%p823_p11), %s675_s9, 4294967168  ;;  %p19_p0 = scmp.ge.s32.totalorder %s1152_s12, 4   ;;  %s1328_s18 = smov %s1051_s19 }
 0x3d6   : > { %s1329_s19 = smov %s1055_s20  ;;  %s1330_s20 = smov %s1163_s15 }
 0x3d7   : > { %s1331_s21 = smov %s1152_s12  ;;  %21 = sbr.rel (!%p19_p0) target bundleno = 6 (0x6), region = 102 }
 0x3dc   :  { %681 = vsyncpa [#allocation6], 1 }
 0x3dd   :  { %683 = vsyncpa [#allocation6 + $0x1], 1 }
 0x3de   :  { %684 = vsyncpa [#allocation9], 1 }
 0x3df   :  { %685 = vsyncpa [#allocation7], 1 }
 0x3e0   :  { %687 = vsyncpa [#allocation7 + $0x1], 1 }

</bundles_post_ra>
